<compile_context>
chip_gen: v5e
topology: v5e:2x2
jax: 0.10.0
libtpu: 0.0.40
codegen_flags: <defaults>
</compile_context>

<pallas_src>
import jax
import jax.numpy as jnp
from jax.experimental import pallas as pl
from jax.experimental.pallas import tpu as pltpu


def _dropout2d_kernel(mult_ref, x_ref, o_ref):
    # Pure streaming VPU op: broadcast the (tb, 1) per-plane multiplier
    # (0 or 1/(1-p), already in x.dtype) across a (tb, tl) tile of planes.
    o_ref[...] = x_ref[...] * mult_ref[...]


def dropout2d(x, *, p=0.4, seed=0, training=True):
    """nn.Dropout2d(p) forward on an NCHW tensor (channel-wise dropout).

    Note: torch's `inplace=True` has no meaning under JAX functional
    semantics; a new array is returned.
    """
    if not training or p == 0.0:
        return x
    if p >= 1.0:
        return jnp.zeros_like(x)  # torch allows p=1: everything dropped

    N, C, H, W = x.shape
    rows, L = N * C, H * W
    xr = x.reshape(rows, L)  # each row = one flattened channel plane
    itemsize = x.dtype.itemsize

    keep_prob = 1.0 - p
    scale = 1.0 / keep_prob

    # Per-plane multiplier in {0, 1/(1-p)}, drawn in the wrapper (tiny: one
    # draw per (n, c) plane). Kept in x.dtype so the kernel multiply runs
    # natively (bf16 VPU on v6e/v7x) with no upcast.
    # TODO(synk): torch's exact RNG stream is not reproducible; jax.random is
    # used for the channel mask instead (structural semantics are identical).
    key = jax.random.PRNGKey(seed)
    keep = jax.random.bernoulli(key, keep_prob, (rows, 1))
    mult = jnp.where(keep,
                     jnp.asarray(scale, dtype=x.dtype),
                     jnp.asarray(0, dtype=x.dtype))

    # --- Tiling -------------------------------------------------------------
    # Target ~4 MiB of input per grid step (streaming kernel: bigger blocks
    # amortize the ~0.35 us/step overhead and cut DMA descriptor count).
    target_bytes = 4 << 20
    # Lane (last) dim: take the full plane when it fits the budget with >= 8
    # rows, otherwise chunk it in multiples of 128 (keeps stores lane-dense
    # and VMEM bounded even for huge planes).
    max_tl = max(128, (target_bytes // (8 * itemsize) // 128) * 128)
    tl = L if L <= max_tl else max_tl
    # TODO(synk): when H*W is not a multiple of 128, pack g planes per row so
    # the output last dim is lane-dense; current layout is correct but uses
    # masked partial stores for lane-sparse planes.

    # Sublane (row) dim: fill the budget, but keep >= ~4 grid steps when the
    # row count allows (pipelining slack + v7x two-TC sharding).
    rows_for_target = max(1, target_bytes // (tl * itemsize))
    min_steps = 4
    tb = min(rows, rows_for_target, max(8, pl.cdiv(rows, min_steps)))
    if tb < rows:
        tb = max(8, (tb // 8) * 8)  # sublane multiple of 8 for partial tiling
    grid = (pl.cdiv(rows, tb), pl.cdiv(L, tl))

    # Explicit VMEM budget: in + out double-buffered blocks, mask buffers,
    # and headroom. Capped well below v7x's 64 MiB physical VMEM.
    block_bytes = tb * tl * itemsize
    vmem_limit = int(min(64 << 20, max(32 << 20, 6 * block_bytes + (4 << 20))))

    out = pl.pallas_call(
        _dropout2d_kernel,
        out_shape=jax.ShapeDtypeStruct((rows, L), x.dtype),
        grid=grid,
        in_specs=[
            pl.BlockSpec((tb, 1), lambda i, j: (i, 0)),   # per-plane multiplier
            pl.BlockSpec((tb, tl), lambda i, j: (i, j)),  # plane data
        ],
        out_specs=pl.BlockSpec((tb, tl), lambda i, j: (i, j)),
        compiler_params=pltpu.CompilerParams(
            dimension_semantics=("parallel", "parallel"),
            vmem_limit_bytes=vmem_limit,
        ),
        cost_estimate=pl.CostEstimate(
            flops=rows * L,
            transcendentals=0,
            bytes_accessed=2 * rows * L * itemsize + rows * itemsize,
        ),
    )(mult, xr)

    return out.reshape(N, C, H, W)


if __name__ == "__main__":
    key = jax.random.PRNGKey(0)
    N, C, H, W = 2, 4, 16, 16
    p = 0.4
    x = jax.random.normal(key, (N, C, H, W), dtype=jnp.float32)

    y = dropout2d(x, p=p, seed=1234, training=True)
    jax.block_until_ready(y)
    assert y.shape == x.shape, y.shape

    # Dropout2d invariant: every (n, c) plane is either all zeros or exactly
    # the input plane scaled by 1/(1-p).
    scale = 1.0 / (1.0 - p)
    yp = y.reshape(N * C, H * W)
    xp = x.reshape(N * C, H * W)
    dropped = jnp.all(yp == 0.0, axis=1)
    kept = jnp.all(
        jnp.abs(yp - xp * scale) <= 1e-5 * jnp.abs(xp * scale) + 1e-6, axis=1)
    assert bool(jnp.all(dropped | kept)), "a plane is neither dropped nor scaled"

    # Eval mode is the identity.
    y_eval = dropout2d(x, p=p, training=False)
    assert jnp.array_equal(y_eval, x)

    # p = 1.0 drops everything (torch-compatible).
    y_all = dropout2d(x, p=1.0, seed=7, training=True)
    assert bool(jnp.all(y_all == 0.0))

    print("KERNEL_OK")
</pallas_src>

<mosaic_0001>
module attributes {stable_mosaic.version = 11 : i64} {
  func.func @_dropout2d_kernel(%arg0: i32, %arg1: i32, %arg2: memref<8x1xf32, #tpu.memory_space<vmem>>, %arg3: memref<8x256xf32, #tpu.memory_space<vmem>>, %arg4: memref<8x256xf32, #tpu.memory_space<vmem>>) attributes {dimension_semantics = [#tpu.dimension_semantics<parallel>, #tpu.dimension_semantics<parallel>], iteration_bounds = array<i64: 1, 1>, scalar_prefetch = 0 : i64, scratch_operands = 0 : i64, tpu.core_type = #tpu.core_type<tc>, window_params = [{transform_indices = @transform_0, window_bounds = array<i64: 8, 1>}, {transform_indices = @transform_1, window_bounds = array<i64: 8, 256>}, {transform_indices = @transform_2, window_bounds = array<i64: 8, 256>}]} {
    %c0 = arith.constant 0 : index
    %c0_0 = arith.constant 0 : index
    %0 = vector.load %arg3[%c0, %c0_0] : memref<8x256xf32, #tpu.memory_space<vmem>>, vector<8x256xf32>
    %c0_1 = arith.constant 0 : index
    %c0_2 = arith.constant 0 : index
    %1 = vector.load %arg2[%c0_1, %c0_2] : memref<8x1xf32, #tpu.memory_space<vmem>>, vector<8x1xf32>
    %2 = vector.broadcast %1 : vector<8x1xf32> to vector<8x256xf32>
    %3 = arith.mulf %0, %2 : vector<8x256xf32>
    %c0_3 = arith.constant 0 : index
    %c0_4 = arith.constant 0 : index
    %4 = vector.load %arg4[%c0_3, %c0_4] : memref<8x256xf32, #tpu.memory_space<vmem>>, vector<8x256xf32>
    tpu.vector_store %arg4[%c0_3, %c0_4], %3 {strides = array<i32>} : memref<8x256xf32, #tpu.memory_space<vmem>>, vector<8x256xf32>,
    return
  }
  func.func @transform_0(%arg0: i32, %arg1: i32) -> (i32, i32) {
    %c0_i32 = arith.constant 0 : i32
    %c0_i32_0 = arith.constant 0 : i32
    return %arg0, %c0_i32 : i32, i32
  }
  func.func @transform_1(%arg0: i32, %arg1: i32) -> (i32, i32) {
    %c0_i32 = arith.constant 0 : i32
    return %arg0, %arg1 : i32, i32
  }
  func.func @transform_2(%arg0: i32, %arg1: i32) -> (i32, i32) {
    %c0_i32 = arith.constant 0 : i32
    return %arg0, %arg1 : i32, i32
  }
}

</mosaic_0001>

<bundles_post_ra>
// kernel: tpu_custom_call.1
= control target key start
LH: loop header
LB: loop body
LE: loop exit
PB: predicated region body
PF: predicated region fallthrough
CT: control target
= control target key end

     0   :  { %7 = vsyncpa [#allocation3], 0  ;;  %s138_s0 = inlined_call_operand.vmem [shape: f32[8,1], index: 0, kind: input, shape index: {}]   ;;  %s139_s1 = inlined_call_operand.hbm [shape: f32[8,256], index: 1, kind: input, shape index: {}]   ;;  %s140_s2 = inlined_call_operand.hbm [shape: f32[8,256], index: 2, kind: output, shape index: {}]  }
   0x1   :  { %8 = vsyncpa [#allocation4], 0  ;;  %s16_s11 = sshll.u32 %s139_s1, 4  ;;  %s111_s12 = smov [#allocation2]   ;;  %s17_s11 = int_to_ptr.hbm [resolvable:$true] %s16_s11 }
   0x2   :  { %s18_s13 = sshll.u32 %s111_s12, 4  ;;  %s19_s13 = int_to_ptr.vmem [resolvable:$true] %s18_s13 }
   0x3   :  { %21 = dma.hbm_to_vmem [thread:$0]  %s17_s11, 256, %s19_s13, [#allocation3]  }
   0x4   :  { %107 = dma.done.wait [#allocation3], 256  }
   0x5   :  { %108 = vsyncadd [#allocation3], 4294967040  ;;  %v112_v0 = vmov 0   ;;  %v28_v1 = vld [vmem:[%s138_s0] sm:$0xff]  ;;  %v27_v3 = vld [vmem:[#allocation2 + $0x8] sm:$0xff]  ;;  %s113_s16 = smov [#allocation5]  }
   0x6   :  { %58 = vset.pattern.permute.xlu0 %v112_v0  ;;  %v26_v2 = vld [vmem:[#allocation2] sm:$0xff]  ;;  %s43_s17 = sshll.u32 %s113_s16, 4  ;;  %s45_s19 = sshll.u32 %s140_s2, 4  ;;  %s44_s17 = int_to_ptr.vmem [resolvable:$true] %s43_s17  ;;  %s46_s19 = int_to_ptr.hbm [resolvable:$true] %s45_s19 }
   0x7   :  { %31 = vperm.xlu0 %58, %v28_v1  }
  0x79   :  { %v32_v4 = vpop.permute.xlu0 %31 }
  0x7a   :  { %v34_v5 = vmul.f32 %v32_v4, %v26_v2  ;;  %v35_v6 = vmul.f32 %v32_v4, %v27_v3 }
  0x7c   :  { %36 = vst [vmem:[#allocation5] sm:$0xff] %v34_v5 }
  0x7d   :  { %37 = vst [vmem:[#allocation5 + $0x8] sm:$0xff] %v35_v6 }
  0x7e   :  { %48 = dma.vmem_to_hbm [thread:$0]  %s44_s17, 256, %s46_s19, [#allocation4]  }
  0x7f   :  { %109 = dma.done.wait [#allocation4], 256  }
  0x80   :  { %110 = vsyncadd [#allocation4], 4294967040 }
  0x81   :  { %53 = vsyncpa [#allocation3], 1 }
  0x82   :  { %54 = vsyncpa [#allocation4], 1 }

</bundles_post_ra>
